<compile_context>
chip_gen: v7x
topology: tpu7x:2x2x1
jax: 0.10.0
libtpu: 0.0.40
codegen_flags: <defaults>
</compile_context>

<pallas_src>
import jax
import jax.numpy as jnp
from jax.experimental import pallas as pl
from jax.experimental.pallas import tpu as pltpu


def _round_up(x, m):
    return (x + m - 1) // m * m


def mlp_s_kernel(x_ref, w1_ref, w2_ref, b2_ref, o_ref):
    # x_ref : [12, TB]        bf16  (row 11 == ones -> folds b1 into the matmul)
    # w1_ref: [units_pad, 12] bf16  (lin1.weight, col 11 == b1; rows zero-padded to 128)
    # w2_ref: [1, units_pad]  f32   (lin2.weight, zero-padded columns)
    # b2_ref: [1, 1]          f32   SMEM scalar
    # o_ref : [1, TB]         f32   lane-dense output
    h = jnp.maximum(
        jnp.dot(w1_ref[...], x_ref[...], preferred_element_type=jnp.float32), 0.0
    )                                                                       # [units_pad, TB]
    # N=1 second layer on the MXU (idle here) instead of VPU mul + XLU reduce.
    y = jnp.dot(w2_ref[...], h, preferred_element_type=jnp.float32) + b2_ref[0, 0]  # [1, TB]
    o_ref[...] = jax.nn.sigmoid(y).astype(o_ref.dtype)


def _choose_tile(B, block_b):
    """Lane-aligned batch tile; >=2 grid steps whenever the batch allows (v7x 2-TC sharding)."""
    b_pad_min = _round_up(B, 128)
    if b_pad_min >= 256:
        tb_cap = (b_pad_min // 2) // 128 * 128        # guarantees grid >= 2
        tb = min(_round_up(block_b, 128), tb_cap)
    else:
        tb = b_pad_min
    tb = max(tb, 128)
    b_pad = _round_up(B, tb)
    return tb, b_pad


def mlp_s_forward_feature_major(x_aug, w1_aug, w2_pad, b2, *, tb):
    """Core pallas_call. x_aug: [12, b_pad] bf16 (last row = ones), batch already padded to tb."""
    k_aug, b_pad = x_aug.shape
    units_pad = w1_aug.shape[0]
    grid = (b_pad // tb,)

    # VMEM budget: double-buffered x/out tiles + f32 [units_pad, tb] temporaries.
    vmem_est = (2 * 16 * tb * 2            # x tiles (bf16, sublane-padded), 2 buffers
                + 2 * 8 * tb * 4           # out tiles (f32, sublane-padded), 2 buffers
                + 3 * units_pad * tb * 4   # h / relu temporaries (f32)
                + (2 << 20))               # weights + headroom
    vmem_limit = int(min(max(vmem_est, 32 << 20), 48 << 20))   # fits v7x's 64 MiB physical

    out_t = pl.pallas_call(
        mlp_s_kernel,
        grid=grid,
        out_shape=jax.ShapeDtypeStruct((1, b_pad), jnp.float32),
        in_specs=[
            # x tile: the only per-step moving data.
            pl.BlockSpec((k_aug, tb), lambda i: (0, i)),
            # Weights: constant block index -> fetched once, stay VMEM-resident.
            pl.BlockSpec((units_pad, k_aug), lambda i: (0, 0)),
            pl.BlockSpec((1, units_pad), lambda i: (0, 0)),
            pl.BlockSpec(memory_space=pltpu.MemorySpace.SMEM),
        ],
        out_specs=pl.BlockSpec((1, tb), lambda i: (0, i)),
        compiler_params=pltpu.CompilerParams(
            dimension_semantics=("parallel",),   # shards batch over 2 TCs on v7x
            vmem_limit_bytes=vmem_limit,
        ),
    )(x_aug, w1_aug, w2_pad, b2)
    return out_t


def mlp_s_forward(x, w1, b1, w2, b2, *, block_b=8192, compute_dtype=jnp.bfloat16):
    """Forward pass of MLP_S.

    x : [B, 11] float32                 (PyTorch layout)
    w1: [units, 11], b1: [units]        (== lin1.weight / lin1.bias)
    w2: [1, units],  b2: [1]            (== lin2.weight / lin2.bias)
    returns [B, 1] float32
    """
    B, in_f = x.shape
    units = w1.shape[0]
    units_pad = _round_up(units, 128)
    tb, b_pad = _choose_tile(B, block_b)

    # NOTE(perf): this transpose/cast/pad is a separate XLA pass over x in HBM; if the
    # upstream producer can emit feature-major bf16 directly, call
    # mlp_s_forward_feature_major and skip it.
    x_t = x.T.astype(compute_dtype)                                         # [11, B]
    x_aug = jnp.concatenate([x_t, jnp.ones((1, B), compute_dtype)], axis=0)  # [12, B]
    x_aug = jnp.pad(x_aug, ((0, 0), (0, b_pad - B)))                         # [12, b_pad]

    # Fold b1 into w1 (bf16) and zero-pad units -> units_pad; padded rows contribute
    # relu(0) = 0 and are zeroed again by the padded w2 columns.
    w1_aug = jnp.concatenate([w1, b1.reshape(units, 1)], axis=1)             # [units, 12] f32
    w1_aug = jnp.pad(w1_aug, ((0, units_pad - units), (0, 0))).astype(compute_dtype)
    w2_pad = jnp.pad(w2.reshape(1, units).astype(jnp.float32),
                     ((0, 0), (0, units_pad - units)))                       # [1, units_pad]
    b2_k = b2.reshape(1, 1).astype(jnp.float32)                              # SMEM scalar

    out_t = mlp_s_forward_feature_major(x_aug, w1_aug, w2_pad, b2_k, tb=tb)

    # Back to PyTorch output layout [B, 1]; padded batch columns are dropped here.
    return out_t[0, :B].reshape(B, 1)


def init_params(key, in_features=11, units=100):
    # Mimics PyTorch Linear's U(-1/sqrt(fan_in), 1/sqrt(fan_in)); PyTorch weight layout.
    k1, k2, k3, k4 = jax.random.split(key, 4)
    lim1 = 1.0 / jnp.sqrt(jnp.float32(in_features))
    lim2 = 1.0 / jnp.sqrt(jnp.float32(units))
    w1 = jax.random.uniform(k1, (units, in_features), jnp.float32, -lim1, lim1)
    b1 = jax.random.uniform(k2, (units,), jnp.float32, -lim1, lim1)
    w2 = jax.random.uniform(k3, (1, units), jnp.float32, -lim2, lim2)
    b2 = jax.random.uniform(k4, (1,), jnp.float32, -lim2, lim2)
    return w1, b1, w2, b2


if __name__ == "__main__":
    key = jax.random.PRNGKey(0)
    kx, kp = jax.random.split(key)

    batch, in_features, units = 16, 11, 100   # units=100 is the module default
    x = jax.random.normal(kx, (batch, in_features), dtype=jnp.float32)
    w1, b1, w2, b2 = init_params(kp, in_features=in_features, units=units)

    fwd = jax.jit(mlp_s_forward)
    out = jax.block_until_ready(fwd(x, w1, b1, w2, b2))
    assert out.shape == (batch, 1)

    # Reference at kernel precision (x / w1 / b1 streamed as bf16, f32 accumulation).
    xb = x.astype(jnp.bfloat16).astype(jnp.float32)
    w1b = w1.astype(jnp.bfloat16).astype(jnp.float32)
    b1b = b1.astype(jnp.bfloat16).astype(jnp.float32)
    ref = jax.nn.sigmoid(jnp.maximum(xb @ w1b.T + b1b[None, :], 0.0) @ w2.T + b2[None, :])
    assert jnp.allclose(out, ref, atol=1e-4, rtol=1e-4)

    # And against pure-f32 PyTorch semantics (loose tol only for the bf16 streaming cast).
    ref32 = jax.nn.sigmoid(jnp.maximum(x @ w1.T + b1[None, :], 0.0) @ w2.T + b2[None, :])
    assert jnp.allclose(out, ref32, atol=2e-2, rtol=2e-2)

    print("KERNEL_OK")
</pallas_src>

<mosaic_0001>
module attributes {stable_mosaic.version = 11 : i64} {
  func.func @mlp_s_kernel(%arg0: i32, %arg1: memref<12x128xbf16, #tpu.memory_space<vmem>>, %arg2: memref<128x12xbf16, #tpu.memory_space<vmem>>, %arg3: memref<1x128xf32, #tpu.memory_space<vmem>>, %arg4: memref<1x1xf32, #tpu.memory_space<smem>>, %arg5: memref<1x128xf32, #tpu.memory_space<vmem>>) attributes {dimension_semantics = [#tpu.dimension_semantics<parallel>], iteration_bounds = array<i64: 1>, scalar_prefetch = 0 : i64, scratch_operands = 0 : i64, tpu.core_type = #tpu.core_type<tc>, window_params = [{transform_indices = @transform_0, window_bounds = array<i64: 12, 128>}, {pipeline_mode = #tpu.pipeline_mode<synchronous>, transform_indices = @transform_1, window_bounds = array<i64: 128, 12>}, {pipeline_mode = #tpu.pipeline_mode<synchronous>, transform_indices = @transform_2, window_bounds = array<i64: 1, 128>}, {transform_indices = @transform_3, window_bounds = array<i64: 1, 1>}, {transform_indices = @transform_4, window_bounds = array<i64: 1, 128>}]} {
    %c0 = arith.constant 0 : index
    %c0_0 = arith.constant 0 : index
    %0 = vector.load %arg2[%c0, %c0_0] : memref<128x12xbf16, #tpu.memory_space<vmem>>, vector<128x12xbf16>
    %c0_1 = arith.constant 0 : index
    %c0_2 = arith.constant 0 : index
    %1 = vector.load %arg1[%c0_1, %c0_2] : memref<12x128xbf16, #tpu.memory_space<vmem>>, vector<12x128xbf16>
    %cst = arith.constant dense<0.000000e+00> : vector<128x128xf32>
    %2 = tpu.matmul %0, %1, %cst {dimension_numbers = #tpu.dot_dimension_numbers<[1], [0], [0], [1], [0, 0, 1, 1], [], []>} : vector<128x12xbf16>, vector<12x128xbf16>, vector<128x128xf32> -> vector<128x128xf32>
    %cst_3 = arith.constant 0.000000e+00 : f32
    %3 = vector.broadcast %cst_3 : f32 to vector<128x128xf32>
    %4 = arith.maximumf %2, %3 : vector<128x128xf32>
    %c0_4 = arith.constant 0 : index
    %c0_5 = arith.constant 0 : index
    %5 = vector.load %arg3[%c0_4, %c0_5] : memref<1x128xf32, #tpu.memory_space<vmem>>, vector<1x128xf32>
    %cst_6 = arith.constant dense<0.000000e+00> : vector<1x128xf32>
    %6 = tpu.matmul %5, %4, %cst_6 {dimension_numbers = #tpu.dot_dimension_numbers<[1], [0], [0], [1], [0, 0, 1, 1], [], []>} : vector<1x128xf32>, vector<128x128xf32>, vector<1x128xf32> -> vector<1x128xf32>
    %c0_7 = arith.constant 0 : index
    %c0_8 = arith.constant 0 : index
    %7 = memref.load %arg4[%c0_7, %c0_8] : memref<1x1xf32, #tpu.memory_space<smem>>
    %8 = vector.broadcast %7 : f32 to vector<1x128xf32>
    %9 = arith.addf %6, %8 : vector<1x128xf32>
    %10 = arith.negf %9 : vector<1x128xf32>
    %11 = math.exp %10 : vector<1x128xf32>
    %cst_9 = arith.constant 1.000000e+00 : f32
    %12 = vector.broadcast %cst_9 : f32 to vector<1x128xf32>
    %13 = arith.addf %12, %11 : vector<1x128xf32>
    %14 = arith.divf %12, %13 : vector<1x128xf32>
    %c0_10 = arith.constant 0 : index
    %c0_11 = arith.constant 0 : index
    %15 = vector.load %arg5[%c0_10, %c0_11] : memref<1x128xf32, #tpu.memory_space<vmem>>, vector<1x128xf32>
    tpu.vector_store %arg5[%c0_10, %c0_11], %14 {strides = array<i32>} : memref<1x128xf32, #tpu.memory_space<vmem>>, vector<1x128xf32>,
    return
  }
  func.func @transform_0(%arg0: i32) -> (i32, i32) {
    %c0_i32 = arith.constant 0 : i32
    %c0_i32_0 = arith.constant 0 : i32
    return %c0_i32, %arg0 : i32, i32
  }
  func.func @transform_1(%arg0: i32) -> (i32, i32) {
    %c0_i32 = arith.constant 0 : i32
    %c0_i32_0 = arith.constant 0 : i32
    %c0_i32_1 = arith.constant 0 : i32
    return %c0_i32, %c0_i32_0 : i32, i32
  }
  func.func @transform_2(%arg0: i32) -> (i32, i32) {
    %c0_i32 = arith.constant 0 : i32
    %c0_i32_0 = arith.constant 0 : i32
    %c0_i32_1 = arith.constant 0 : i32
    return %c0_i32, %c0_i32_0 : i32, i32
  }
  func.func @transform_3(%arg0: i32) -> (i32, i32) {
    %c0_i32 = arith.constant 0 : i32
    %c0_i32_0 = arith.constant 0 : i32
    %c0_i32_1 = arith.constant 0 : i32
    return %c0_i32, %c0_i32_0 : i32, i32
  }
  func.func @transform_4(%arg0: i32) -> (i32, i32) {
    %c0_i32 = arith.constant 0 : i32
    %c0_i32_0 = arith.constant 0 : i32
    return %c0_i32, %arg0 : i32, i32
  }
}

</mosaic_0001>

<bundles_post_ra>
// kernel: mlp_s_forward.1
= control target key start
LH: loop header
LB: loop body
LE: loop exit
PB: predicated region body
PF: predicated region fallthrough
CT: control target
= control target key end

     0   :  { %vm107_vm0 = vcmask 1045504   ;;  %vm82_vm1 = vcmask 97280   ;;  %v446_v10 = vmov 0.0|0.0   ;;  %vm447_vm2 = vmmov 0   ;;  %s518_s0 = inlined_call_operand.vmem [shape: bf16[12,128], index: 0, kind: input, shape index: {}]   ;;  %s519_s1 = inlined_call_operand.vmem [shape: bf16[128,12], index: 1, kind: input, shape index: {}]   ;;  %s520_s2 = inlined_call_operand.vmem [shape: f32[1,128], index: 2, kind: input, shape index: {}]   ;;  %s521_s3 = inlined_call_operand.<no memory space> [shape: f32[1,1], index: 3, kind: input, shape index: {}]   ;;  %s522_s4 = inlined_call_operand.vmem [shape: f32[1,128], index: 4, kind: output, shape index: {}]  }
   0x1   :  { %v433_v0 = vld [vmem:[%s518_s0] sm:$0x3f]   ;;  %v435_v3 = vld [vmem:[%s519_s1 + $0x8] sm:$0xff]   ;;  %v436_v4 = vld [vmem:[%s519_s1 + $0x10] sm:$0xff]   ;;  %405 = vmatprep.subr.bf16.mxu1 %v446_v10  ;;  %v448_v11 = vmov 0.0   ;;  %v226_v53 = vstv %s521_s3 }
   0x2   :  { %v434_v1 = vld [vmem:[%s519_s1] sm:$0xff]   ;;  %429 = vmatprep.subr.msk.bf16.mxu0 %vm107_vm0, %v433_v0  ;;  %v109_v2 = vsel %vm107_vm0, %v433_v0, 0  ;;  %v437_v5 = vld [vmem:[%s519_s1 + $0x18] sm:$0xff]   ;;  %v439_v7 = vld [vmem:[%s519_s1 + $0x28] sm:$0xff]   ;;  %402 = vmatprep.mubr.msk.f32.mxu1 %vm447_vm2, %v448_v11 }
   0x3   :  { %353 = vmatpush3.bf16.msra.mxu0 %v109_v2  ;;  %354 = vmatprep.mubr.msk.bf16.mxu0 %vm82_vm1, %v434_v1  ;;  %v438_v6 = vld [vmem:[%s519_s1 + $0x20] sm:$0xff]   ;;  %v440_v8 = vld [vmem:[%s519_s1 + $0x30] sm:$0xff]   ;;  %v441_v9 = vld [vmem:[%s519_s1 + $0x38] sm:$0xff]  }
   0x4   :  { %v224_v52 = vld [vmem:[%s520_s2] sm:$0x1] }
   0x6   :  { %355 = vmatmul.mubr.msk.bf16.vlgmr.msra.gmra.mrb[0].mxu0 %vm82_vm1, %v435_v3 }
   0x7   :  { %358 = vmatprep.mubr.msk.bf16.mxu0 %vm82_vm1, %v436_v4 }
   0xe   :  { %359 = vmatmul.mubr.msk.bf16.gmra.mrb[4].mxu0 %vm82_vm1, %v437_v5 }
   0xf   :  { %362 = vmatprep.mubr.msk.bf16.mxu0 %vm82_vm1, %v438_v6 }
  0x16   :  { %363 = vmatmul.mubr.msk.bf16.gmra.mrb[8].mxu0 %vm82_vm1, %v439_v7 }
  0x17   :  { %366 = vmatprep.mubr.msk.bf16.mxu0 %vm82_vm1, %v440_v8 }
  0x1e   :  { %367 = vmatmul.mubr.msk.bf16.gmra.mrb[12].mxu0 %vm82_vm1, %v441_v9 }
  0xd9   :  { %v356_v12 = vpop.f32.mrb[0].mxu0 }
  0xda   :  { %v145_v13 = vpop.f32.mrb[1].mxu0  ;;  %v210_v15 = vmax.f32 %v356_v12, 0.0 }
  0xdb   :  { %v357_v14 = vpop.f32.mrb[2].mxu0  ;;  %v208_v18 = vmax.f32 %v145_v13, 0.0 }
  0xdc   :  { %v211_v16 = vmax.f32 %v357_v14, 0.0  ;;  %v148_v17 = vpop.f32.mrb[3].mxu0 }
  0xdd   :  { %v209_v19 = vmax.f32 %v148_v17, 0.0 }
  0xde   :  { %v409_v20 = vpack.c.bf16 %v211_v16, %v210_v15 }
  0xdf   :  { %v406_v21 = vpack.c.bf16 %v209_v19, %v208_v18 }
  0xe1   :  { %v360_v22 = vpop.f32.mrb[4].mxu0  ;;  %407 = vmatpush3.bf16.msra.mxu1 %v406_v21 }
  0xe2   :  { %v161_v23 = vpop.f32.mrb[5].mxu0  ;;  %408 = vmatprep.subr.bf16.mxu1 %v446_v10  ;;  %v214_v25 = vmax.f32 %v360_v22, 0.0 }
  0xe3   :  { %v361_v24 = vpop.f32.mrb[6].mxu0  ;;  %v212_v28 = vmax.f32 %v161_v23, 0.0 }
  0xe4   :  { %v215_v26 = vmax.f32 %v361_v24, 0.0  ;;  %v164_v27 = vpop.f32.mrb[7].mxu0 }
  0xe5   :  { %v213_v29 = vmax.f32 %v164_v27, 0.0  ;;  %410 = vmatpush3.bf16.msra.mxu1 %v409_v20 }
  0xe6   :  { %v415_v30 = vpack.c.bf16 %v215_v26, %v214_v25  ;;  %411 = vmatprep.subr.bf16.mxu1 %v446_v10 }
  0xe7   :  { %v412_v31 = vpack.c.bf16 %v213_v29, %v212_v28 }
  0xe9   :  { %v364_v32 = vpop.f32.mrb[8].mxu0  ;;  %413 = vmatpush3.bf16.msra.mxu1 %v412_v31 }
  0xea   :  { %v177_v33 = vpop.f32.mrb[9].mxu0  ;;  %414 = vmatprep.subr.bf16.mxu1 %v446_v10  ;;  %v218_v35 = vmax.f32 %v364_v32, 0.0 }
  0xeb   :  { %v365_v34 = vpop.f32.mrb[10].mxu0  ;;  %v216_v38 = vmax.f32 %v177_v33, 0.0 }
  0xec   :  { %v219_v36 = vmax.f32 %v365_v34, 0.0  ;;  %v180_v37 = vpop.f32.mrb[11].mxu0 }
  0xed   :  { %v217_v39 = vmax.f32 %v180_v37, 0.0  ;;  %416 = vmatpush3.bf16.msra.mxu1 %v415_v30 }
  0xee   :  { %v421_v40 = vpack.c.bf16 %v219_v36, %v218_v35  ;;  %417 = vmatprep.subr.bf16.mxu1 %v446_v10 }
  0xef   :  { %v418_v41 = vpack.c.bf16 %v217_v39, %v216_v38 }
  0xf1   :  { %v368_v42 = vpop.f32.mrb[12].mxu0  ;;  %419 = vmatpush3.bf16.msra.mxu1 %v418_v41 }
  0xf2   :  { %v193_v43 = vpop.f32.mrb[13].mxu0  ;;  %420 = vmatprep.subr.bf16.mxu1 %v446_v10  ;;  %v222_v45 = vmax.f32 %v368_v42, 0.0 }
  0xf3   :  { %v369_v44 = vpop.f32.mrb[14].mxu0  ;;  %v220_v48 = vmax.f32 %v193_v43, 0.0 }
  0xf4   :  { %v223_v46 = vmax.f32 %v369_v44, 0.0  ;;  %v196_v47 = vpop.f32.mrb[15].mxu0 }
  0xf5   :  { %v221_v49 = vmax.f32 %v196_v47, 0.0  ;;  %422 = vmatpush3.bf16.msra.mxu1 %v421_v40 }
  0xf6   :  { %v427_v50 = vpack.c.bf16 %v223_v46, %v222_v45  ;;  %423 = vmatprep.subr.bf16.mxu1 %v446_v10 }
  0xf7   :  { %v424_v51 = vpack.c.bf16 %v221_v49, %v220_v48 }
  0xf9   :  { %425 = vmatpush3.bf16.msra.mxu1 %v424_v51 }
  0xfa   :  { %426 = vmatprep.subr.bf16.mxu1 %v446_v10 }
  0xfd   :  { %428 = vmatpush3.bf16.msra.mxu1 %v427_v50 }
 0x100   :  { %403 = vmatmul.mubr.f32.vlgmr.msra.gmra.mrb[0].mxu1 %v224_v52 }
 0x1d3   :  { %v293_v54 = vpop.f32.mrb[0].mxu1 }
 0x1d4   :  { %v294_v55 = vadd.f32 %v293_v54, %v226_v53  ;;  %v404_v56 = vpop.f32.mrb[1].mxu1 }
 0x1d6   :  { %v325_v57 = vmul.f32 -1.442695, %v294_v55 }
 0x1d8   :  { %442 = vpow2.f32 %v325_v57 }
 0x1e2   :  { %v443_v58 = vpop.eup %442 }
 0x1e3   :  { %v300_v59 = vadd.f32 1.0, %v443_v58 }
 0x1e5   :  { %444 = vrcp.f32 %v300_v59 }
 0x1ef   :  { %v445_v60 = vpop.eup %444 }
 0x1f0   :  { %303 = vst [vmem:[%s522_s4] sm:$0x1] %v445_v60 }

</bundles_post_ra>
